<compile_context>
chip_gen: v5e
topology: v5e:2x2
jax: 0.10.0
libtpu: 0.0.40
codegen_flags: <defaults>
</compile_context>

<pallas_src>
import functools

import jax
import jax.numpy as jnp
from jax.experimental import pallas as pl
from jax.experimental.pallas import tpu as pltpu

LN_EPS = 1e-5  # PyTorch nn.LayerNorm default


def ln_td3_critic_kernel(state_dim, action_dim, h1, h2,
                         state_ref, action_ref, param_ref, q_ref):
    """Fused two-head critic.

    param_ref row layout (all offsets static, multiples of 8 for the test shapes):
      [0,            state_dim)         : w1s  = [w1 || w4] state rows
      [state_dim,    in_dim)            : w1a  = [w1 || w4] action rows
      [in_dim,       in_dim + W)        : w2f  = block-diag [[w2,0],[0,w5]] zero-padded
      in_dim + W + 0..7                 : b1||b4, g1||g4, be1||be4,
                                          b2||b5, g2||g5, be2||be5,
                                          [w3^T || w6^T],  [b3, b6, 0...]
    """
    f1, f2 = 2 * h1, 2 * h2
    in_dim = state_dim + action_dim
    W = param_ref.shape[1]
    B = state_ref.shape[0]

    r_w1s = 0
    r_w1a = state_dim
    r_w2 = in_dim
    r_vec = in_dim + W
    r_b1, r_g1, r_be1, r_b2, r_g2, r_be2, r_c3, r_b3 = (r_vec + i for i in range(8))

    # Lane masks, built once and reused (f32 0/1 rows that broadcast over [B, W]).
    lane = jax.lax.broadcasted_iota(jnp.int32, (1, W), 1)
    m_l1 = (lane < h1).astype(jnp.float32)
    m_r1 = jnp.logical_and(lane >= h1, lane < f1).astype(jnp.float32)
    m_l2 = (lane < h2).astype(jnp.float32)
    m_r2 = jnp.logical_and(lane >= h2, lane < f2).astype(jnp.float32)

    def halfwise_layernorm(x, m_l, m_r, half, gamma, beta):
        """LayerNorm applied independently to the two lane halves.

        One-pass statistics: masked sum(x) and sum(x^2) reduced concurrently,
        biased variance, eps inside rsqrt (matches PyTorch nn.LayerNorm).
        Padding lanes (mask 0 everywhere, gamma/beta 0) stay exactly 0.
        """
        inv_n = 1.0 / float(half)
        xl = x * m_l
        xr = x * m_r
        s_l = jnp.sum(xl, axis=-1, keepdims=True)
        s_r = jnp.sum(xr, axis=-1, keepdims=True)
        ss_l = jnp.sum(xl * x, axis=-1, keepdims=True)
        ss_r = jnp.sum(xr * x, axis=-1, keepdims=True)
        mu_l = s_l * inv_n
        mu_r = s_r * inv_n
        var_l = jnp.maximum(ss_l * inv_n - mu_l * mu_l, 0.0)
        var_r = jnp.maximum(ss_r * inv_n - mu_r * mu_r, 0.0)
        mu = m_l * mu_l + m_r * mu_r
        inv_std = (m_l * jax.lax.rsqrt(var_l + LN_EPS)
                   + m_r * jax.lax.rsqrt(var_r + LN_EPS))
        return (x - mu) * inv_std * gamma + beta

    # ---- Layer 1: both heads fused along lanes; state/action row blocks
    #      avoid any wrapper-side concat of the inputs. ----
    h = (jnp.dot(state_ref[...], param_ref[r_w1s:r_w1s + state_dim, :],
                 preferred_element_type=jnp.float32)
         + jnp.dot(action_ref[...], param_ref[r_w1a:r_w1a + action_dim, :],
                   preferred_element_type=jnp.float32)
         + param_ref[r_b1:r_b1 + 1, :])
    h = jnp.maximum(h, 0.0)
    h = halfwise_layernorm(h, m_l1, m_r1, h1,
                           param_ref[r_g1:r_g1 + 1, :],
                           param_ref[r_be1:r_be1 + 1, :])

    # ---- Layer 2: block-diagonal [[w2, 0], [0, w5]] (zero-padded to W lanes). ----
    h = (jnp.dot(h, param_ref[r_w2:r_w2 + W, :], preferred_element_type=jnp.float32)
         + param_ref[r_b2:r_b2 + 1, :])
    h = jnp.maximum(h, 0.0)
    h = halfwise_layernorm(h, m_l2, m_r2, h2,
                           param_ref[r_g2:r_g2 + 1, :],
                           param_ref[r_be2:r_be2 + 1, :])

    # ---- Layer 3: two masked lane-reductions instead of an N=2 MXU matmul. ----
    prod = h * param_ref[r_c3:r_c3 + 1, :]
    q1 = jnp.sum(prod * m_l2, axis=-1, keepdims=True)      # [B, 1]
    q2 = jnp.sum(prod * m_r2, axis=-1, keepdims=True)      # [B, 1]
    b3b6 = param_ref[r_b3:r_b3 + 1, :][:, 0:2]             # [1, 2]: (b3, b6)
    lane2 = jax.lax.broadcasted_iota(jnp.int32, (B, 2), 1)
    q = jnp.where(lane2 == 0,
                  jnp.broadcast_to(q1, (B, 2)),
                  jnp.broadcast_to(q2, (B, 2))) + b3b6
    q_ref[...] = q.astype(q_ref.dtype)


@functools.partial(jax.jit, static_argnames=("h1", "h2"))
def ln_td3_critic_forward(state, action, slab, *, h1, h2):
    B, state_dim = state.shape
    action_dim = action.shape[1]
    f1, f2 = 2 * h1, 2 * h2

    flops = (2 * B * ((state_dim + action_dim) * f1 + f1 * f2 + f2 * 2)
             + 12 * B * (f1 + f2))                      # matmuls + LN/ReLU (advisory)
    bytes_accessed = 4 * (state.size + action.size + slab.size + B * 2)

    vmem = pl.BlockSpec(memory_space=pltpu.MemorySpace.VMEM)
    q = pl.pallas_call(
        functools.partial(ln_td3_critic_kernel, state_dim, action_dim, h1, h2),
        out_shape=jax.ShapeDtypeStruct((B, 2), jnp.float32),
        in_specs=[vmem, vmem, vmem],
        out_specs=vmem,
        cost_estimate=pl.CostEstimate(flops=flops,
                                      transcendentals=4 * B,
                                      bytes_accessed=bytes_accessed),
    )(state, action, slab)
    return q[:, 0:1], q[:, 1:2]


def init_params(key, state_dim, action_dim, h1, h2):
    """Synthetic parameters with shapes matching the PyTorch module.

    Weights are stored transposed: [in_features, out_features].
    Biases / LayerNorm params are [1, features].
    """
    in_dim = state_dim + action_dim
    keys = jax.random.split(key, 12)

    def lin(kw, kb, fan_in, fan_out):
        bound = 1.0 / jnp.sqrt(fan_in)
        w = jax.random.uniform(kw, (fan_in, fan_out), jnp.float32, -bound, bound)
        b = jax.random.uniform(kb, (1, fan_out), jnp.float32, -bound, bound)
        return w, b

    p = {}
    p["w1"], p["b1"] = lin(keys[0], keys[1], in_dim, h1)
    p["g1"] = jnp.ones((1, h1), jnp.float32)
    p["be1"] = jnp.zeros((1, h1), jnp.float32)
    p["w2"], p["b2"] = lin(keys[2], keys[3], h1, h2)
    p["g2"] = jnp.ones((1, h2), jnp.float32)
    p["be2"] = jnp.zeros((1, h2), jnp.float32)
    p["w3"], p["b3"] = lin(keys[4], keys[5], h2, 1)

    p["w4"], p["b4"] = lin(keys[6], keys[7], in_dim, h1)
    p["g4"] = jnp.ones((1, h1), jnp.float32)
    p["be4"] = jnp.zeros((1, h1), jnp.float32)
    p["w5"], p["b5"] = lin(keys[8], keys[9], h1, h2)
    p["g5"] = jnp.ones((1, h2), jnp.float32)
    p["be5"] = jnp.zeros((1, h2), jnp.float32)
    p["w6"], p["b6"] = lin(keys[10], keys[11], h2, 1)
    return p


def pack_params(p, state_dim, action_dim, h1, h2):
    """One-time repack of the PyTorch-layout params into ONE fused [rows, W] slab."""
    f1, f2 = 2 * h1, 2 * h2
    in_dim = state_dim + action_dim
    W = max(128, ((max(f1, f2) + 127) // 128) * 128)

    def pad_lanes(a):
        return jnp.pad(a, ((0, 0), (0, W - a.shape[1])))

    # Layer 1: lane-concat of the two heads (state/action row split is free).
    w1f = pad_lanes(jnp.concatenate([p["w1"], p["w4"]], axis=1))       # [in_dim, W]

    # Layer 2: block-diagonal fused weight, zero-padded to [W, W].
    w2f = jnp.zeros((W, W), jnp.float32)
    w2f = w2f.at[:h1, :h2].set(p["w2"]).at[h1:f1, h2:f2].set(p["w5"])

    def vrow(a, b):
        return pad_lanes(jnp.concatenate([a, b], axis=1))[0]

    c3 = vrow(p["w3"].T, p["w6"].T)                                    # [W]: head contractions
    b3b6 = (jnp.zeros((W,), jnp.float32)
            .at[0].set(p["b3"][0, 0]).at[1].set(p["b6"][0, 0]))

    vec = jnp.stack([
        vrow(p["b1"], p["b4"]), vrow(p["g1"], p["g4"]), vrow(p["be1"], p["be4"]),
        vrow(p["b2"], p["b5"]), vrow(p["g2"], p["g5"]), vrow(p["be2"], p["be5"]),
        c3, b3b6,
    ])                                                                 # [8, W]

    slab = jnp.concatenate([w1f, w2f, vec], axis=0)                    # [in_dim + W + 8, W]
    pad_rows = (-slab.shape[0]) % 8
    if pad_rows:
        slab = jnp.pad(slab, ((0, pad_rows), (0, 0)))
    return slab


def _reference_forward(state, action, params):
    """Plain-JAX reference mirroring the PyTorch module exactly."""
    xu = jnp.concatenate([state, action], axis=1)

    def head(w1, b1, g1, be1, w2, b2, g2, be2, w3, b3):
        h = jnp.maximum(xu @ w1 + b1, 0.0)
        mu = h.mean(-1, keepdims=True)
        var = ((h - mu) ** 2).mean(-1, keepdims=True)
        h = (h - mu) / jnp.sqrt(var + LN_EPS) * g1 + be1
        h = jnp.maximum(h @ w2 + b2, 0.0)
        mu = h.mean(-1, keepdims=True)
        var = ((h - mu) ** 2).mean(-1, keepdims=True)
        h = (h - mu) / jnp.sqrt(var + LN_EPS) * g2 + be2
        return h @ w3 + b3

    p = params
    q1 = head(p["w1"], p["b1"], p["g1"], p["be1"],
              p["w2"], p["b2"], p["g2"], p["be2"], p["w3"], p["b3"])
    q2 = head(p["w4"], p["b4"], p["g4"], p["be4"],
              p["w5"], p["b5"], p["g5"], p["be5"], p["w6"], p["b6"])
    return q1, q2


if __name__ == "__main__":
    state_dim, action_dim = 24, 8
    hidden1, hidden2 = 64, 32
    batch = 8

    key = jax.random.PRNGKey(0)
    k_state, k_action, k_params = jax.random.split(key, 3)

    state = jax.random.normal(k_state, (batch, state_dim), jnp.float32)
    action = jax.random.normal(k_action, (batch, action_dim), jnp.float32)
    params = init_params(k_params, state_dim, action_dim, hidden1, hidden2)

    # Pack once (outside the per-step forward) into the fused single-slab layout.
    slab = pack_params(params, state_dim, action_dim, hidden1, hidden2)
    jax.block_until_ready(slab)

    q1, q2 = ln_td3_critic_forward(state, action, slab, h1=hidden1, h2=hidden2)
    jax.block_until_ready((q1, q2))

    r1, r2 = _reference_forward(state, action, params)
    assert q1.shape == (batch, 1) and q2.shape == (batch, 1)
    assert jnp.allclose(q1, r1, atol=1e-4), "Q1 mismatch vs reference"
    assert jnp.allclose(q2, r2, atol=1e-4), "Q2 mismatch vs reference"

    print("KERNEL_OK")
</pallas_src>

<mosaic_0001>
module attributes {stable_mosaic.version = 11 : i64} {
  func.func @ln_td3_critic_kernel(%arg0: memref<8x24xf32, #tpu.memory_space<vmem>>, %arg1: memref<8x8xf32, #tpu.memory_space<vmem>>, %arg2: memref<168x128xf32, #tpu.memory_space<vmem>>, %arg3: memref<8x2xf32, #tpu.memory_space<vmem>>) attributes {dimension_semantics = [], scalar_prefetch = 0 : i64, scratch_operands = 0 : i64, tpu.core_type = #tpu.core_type<tc>} {
    %0 = tpu.iota {dimensions = array<i32: 1>} : vector<1x128xi32>
    %c64_i32 = arith.constant 64 : i32
    %1 = vector.broadcast %c64_i32 : i32 to vector<1x128xi32>
    %2 = arith.cmpi slt, %0, %1 : vector<1x128xi32>
    %3 = arith.extui %2 : vector<1x128xi1> to vector<1x128xi32>
    %4 = arith.sitofp %3 : vector<1x128xi32> to vector<1x128xf32>
    %c64_i32_0 = arith.constant 64 : i32
    %5 = vector.broadcast %c64_i32_0 : i32 to vector<1x128xi32>
    %6 = arith.cmpi sge, %0, %5 : vector<1x128xi32>
    %c128_i32 = arith.constant 128 : i32
    %7 = vector.broadcast %c128_i32 : i32 to vector<1x128xi32>
    %8 = arith.cmpi slt, %0, %7 : vector<1x128xi32>
    %9 = arith.andi %6, %8 : vector<1x128xi1>
    %10 = arith.extui %9 : vector<1x128xi1> to vector<1x128xi32>
    %11 = arith.sitofp %10 : vector<1x128xi32> to vector<1x128xf32>
    %c32_i32 = arith.constant 32 : i32
    %12 = vector.broadcast %c32_i32 : i32 to vector<1x128xi32>
    %13 = arith.cmpi slt, %0, %12 : vector<1x128xi32>
    %14 = arith.extui %13 : vector<1x128xi1> to vector<1x128xi32>
    %15 = arith.sitofp %14 : vector<1x128xi32> to vector<1x128xf32>
    %c32_i32_1 = arith.constant 32 : i32
    %16 = vector.broadcast %c32_i32_1 : i32 to vector<1x128xi32>
    %17 = arith.cmpi sge, %0, %16 : vector<1x128xi32>
    %c64_i32_2 = arith.constant 64 : i32
    %18 = vector.broadcast %c64_i32_2 : i32 to vector<1x128xi32>
    %19 = arith.cmpi slt, %0, %18 : vector<1x128xi32>
    %20 = arith.andi %17, %19 : vector<1x128xi1>
    %21 = arith.extui %20 : vector<1x128xi1> to vector<1x128xi32>
    %22 = arith.sitofp %21 : vector<1x128xi32> to vector<1x128xf32>
    %c0 = arith.constant 0 : index
    %c0_3 = arith.constant 0 : index
    %23 = vector.load %arg0[%c0, %c0_3] : memref<8x24xf32, #tpu.memory_space<vmem>>, vector<8x24xf32>
    %c0_4 = arith.constant 0 : index
    %c0_5 = arith.constant 0 : index
    %24 = vector.load %arg2[%c0_4, %c0_5] : memref<168x128xf32, #tpu.memory_space<vmem>>, vector<24x128xf32>
    %cst = arith.constant dense<0.000000e+00> : vector<8x128xf32>
    %25 = tpu.matmul %23, %24, %cst {dimension_numbers = #tpu.dot_dimension_numbers<[1], [0], [0], [1], [0, 0, 1, 1], [], []>} : vector<8x24xf32>, vector<24x128xf32>, vector<8x128xf32> -> vector<8x128xf32>
    %c0_6 = arith.constant 0 : index
    %c0_7 = arith.constant 0 : index
    %26 = vector.load %arg1[%c0_6, %c0_7] : memref<8x8xf32, #tpu.memory_space<vmem>>, vector<8x8xf32>
    %c24 = arith.constant 24 : index
    %c0_8 = arith.constant 0 : index
    %27 = vector.load %arg2[%c24, %c0_8] : memref<168x128xf32, #tpu.memory_space<vmem>>, vector<8x128xf32>
    %cst_9 = arith.constant dense<0.000000e+00> : vector<8x128xf32>
    %28 = tpu.matmul %26, %27, %cst_9 {dimension_numbers = #tpu.dot_dimension_numbers<[1], [0], [0], [1], [0, 0, 1, 1], [], []>} : vector<8x8xf32>, vector<8x128xf32>, vector<8x128xf32> -> vector<8x128xf32>
    %29 = arith.addf %25, %28 : vector<8x128xf32>
    %c160 = arith.constant 160 : index
    %c0_10 = arith.constant 0 : index
    %30 = vector.load %arg2[%c160, %c0_10] : memref<168x128xf32, #tpu.memory_space<vmem>>, vector<1x128xf32>
    %31 = vector.broadcast %30 : vector<1x128xf32> to vector<8x128xf32>
    %32 = arith.addf %29, %31 : vector<8x128xf32>
    %cst_11 = arith.constant 0.000000e+00 : f32
    %33 = vector.broadcast %cst_11 : f32 to vector<8x128xf32>
    %34 = arith.maximumf %32, %33 : vector<8x128xf32>
    %c161 = arith.constant 161 : index
    %c0_12 = arith.constant 0 : index
    %35 = vector.load %arg2[%c161, %c0_12] : memref<168x128xf32, #tpu.memory_space<vmem>>, vector<1x128xf32>
    %c162 = arith.constant 162 : index
    %c0_13 = arith.constant 0 : index
    %36 = vector.load %arg2[%c162, %c0_13] : memref<168x128xf32, #tpu.memory_space<vmem>>, vector<1x128xf32>
    %37 = vector.broadcast %4 : vector<1x128xf32> to vector<8x128xf32>
    %38 = arith.mulf %34, %37 : vector<8x128xf32>
    %39 = vector.broadcast %11 : vector<1x128xf32> to vector<8x128xf32>
    %40 = arith.mulf %34, %39 : vector<8x128xf32>
    %cst_14 = arith.constant dense<0.000000e+00> : vector<8xf32>
    %41 = vector.multi_reduction <add>, %38, %cst_14 [1] : vector<8x128xf32> to vector<8xf32>
    %42 = vector.shape_cast %41 : vector<8xf32> to vector<8x1xf32>
    %cst_15 = arith.constant dense<0.000000e+00> : vector<8xf32>
    %43 = vector.multi_reduction <add>, %40, %cst_15 [1] : vector<8x128xf32> to vector<8xf32>
    %44 = vector.shape_cast %43 : vector<8xf32> to vector<8x1xf32>
    %45 = arith.mulf %38, %34 : vector<8x128xf32>
    %cst_16 = arith.constant dense<0.000000e+00> : vector<8xf32>
    %46 = vector.multi_reduction <add>, %45, %cst_16 [1] : vector<8x128xf32> to vector<8xf32>
    %47 = vector.shape_cast %46 : vector<8xf32> to vector<8x1xf32>
    %48 = arith.mulf %40, %34 : vector<8x128xf32>
    %cst_17 = arith.constant dense<0.000000e+00> : vector<8xf32>
    %49 = vector.multi_reduction <add>, %48, %cst_17 [1] : vector<8x128xf32> to vector<8xf32>
    %50 = vector.shape_cast %49 : vector<8xf32> to vector<8x1xf32>
    %cst_18 = arith.constant 1.562500e-02 : f32
    %51 = vector.broadcast %cst_18 : f32 to vector<8x1xf32>
    %52 = arith.mulf %42, %51 : vector<8x1xf32>
    %cst_19 = arith.constant 1.562500e-02 : f32
    %53 = vector.broadcast %cst_19 : f32 to vector<8x1xf32>
    %54 = arith.mulf %44, %53 : vector<8x1xf32>
    %cst_20 = arith.constant 1.562500e-02 : f32
    %55 = vector.broadcast %cst_20 : f32 to vector<8x1xf32>
    %56 = arith.mulf %47, %55 : vector<8x1xf32>
    %57 = arith.mulf %52, %52 : vector<8x1xf32>
    %58 = arith.subf %56, %57 : vector<8x1xf32>
    %cst_21 = arith.constant 0.000000e+00 : f32
    %59 = vector.broadcast %cst_21 : f32 to vector<8x1xf32>
    %60 = arith.maximumf %58, %59 : vector<8x1xf32>
    %cst_22 = arith.constant 1.562500e-02 : f32
    %61 = vector.broadcast %cst_22 : f32 to vector<8x1xf32>
    %62 = arith.mulf %50, %61 : vector<8x1xf32>
    %63 = arith.mulf %54, %54 : vector<8x1xf32>
    %64 = arith.subf %62, %63 : vector<8x1xf32>
    %cst_23 = arith.constant 0.000000e+00 : f32
    %65 = vector.broadcast %cst_23 : f32 to vector<8x1xf32>
    %66 = arith.maximumf %64, %65 : vector<8x1xf32>
    %67 = vector.broadcast %4 : vector<1x128xf32> to vector<8x128xf32>
    %68 = vector.broadcast %52 : vector<8x1xf32> to vector<8x128xf32>
    %69 = arith.mulf %67, %68 : vector<8x128xf32>
    %70 = vector.broadcast %11 : vector<1x128xf32> to vector<8x128xf32>
    %71 = vector.broadcast %54 : vector<8x1xf32> to vector<8x128xf32>
    %72 = arith.mulf %70, %71 : vector<8x128xf32>
    %73 = arith.addf %69, %72 : vector<8x128xf32>
    %cst_24 = arith.constant 9.99999974E-6 : f32
    %74 = vector.broadcast %cst_24 : f32 to vector<8x1xf32>
    %75 = arith.addf %60, %74 : vector<8x1xf32>
    %76 = math.rsqrt %75 : vector<8x1xf32>
    %77 = vector.broadcast %4 : vector<1x128xf32> to vector<8x128xf32>
    %78 = vector.broadcast %76 : vector<8x1xf32> to vector<8x128xf32>
    %79 = arith.mulf %77, %78 : vector<8x128xf32>
    %cst_25 = arith.constant 9.99999974E-6 : f32
    %80 = vector.broadcast %cst_25 : f32 to vector<8x1xf32>
    %81 = arith.addf %66, %80 : vector<8x1xf32>
    %82 = math.rsqrt %81 : vector<8x1xf32>
    %83 = vector.broadcast %11 : vector<1x128xf32> to vector<8x128xf32>
    %84 = vector.broadcast %82 : vector<8x1xf32> to vector<8x128xf32>
    %85 = arith.mulf %83, %84 : vector<8x128xf32>
    %86 = arith.addf %79, %85 : vector<8x128xf32>
    %87 = arith.subf %34, %73 : vector<8x128xf32>
    %88 = arith.mulf %87, %86 : vector<8x128xf32>
    %89 = vector.broadcast %35 : vector<1x128xf32> to vector<8x128xf32>
    %90 = arith.mulf %88, %89 : vector<8x128xf32>
    %91 = vector.broadcast %36 : vector<1x128xf32> to vector<8x128xf32>
    %92 = arith.addf %90, %91 : vector<8x128xf32>
    %c32 = arith.constant 32 : index
    %c0_26 = arith.constant 0 : index
    %93 = vector.load %arg2[%c32, %c0_26] : memref<168x128xf32, #tpu.memory_space<vmem>>, vector<128x128xf32>
    %cst_27 = arith.constant dense<0.000000e+00> : vector<8x128xf32>
    %94 = tpu.matmul %92, %93, %cst_27 {dimension_numbers = #tpu.dot_dimension_numbers<[1], [0], [0], [1], [0, 0, 1, 1], [], []>} : vector<8x128xf32>, vector<128x128xf32>, vector<8x128xf32> -> vector<8x128xf32>
    %c163 = arith.constant 163 : index
    %c0_28 = arith.constant 0 : index
    %95 = vector.load %arg2[%c163, %c0_28] : memref<168x128xf32, #tpu.memory_space<vmem>>, vector<1x128xf32>
    %96 = vector.broadcast %95 : vector<1x128xf32> to vector<8x128xf32>
    %97 = arith.addf %94, %96 : vector<8x128xf32>
    %cst_29 = arith.constant 0.000000e+00 : f32
    %98 = vector.broadcast %cst_29 : f32 to vector<8x128xf32>
    %99 = arith.maximumf %97, %98 : vector<8x128xf32>
    %c164 = arith.constant 164 : index
    %c0_30 = arith.constant 0 : index
    %100 = vector.load %arg2[%c164, %c0_30] : memref<168x128xf32, #tpu.memory_space<vmem>>, vector<1x128xf32>
    %c165 = arith.constant 165 : index
    %c0_31 = arith.constant 0 : index
    %101 = vector.load %arg2[%c165, %c0_31] : memref<168x128xf32, #tpu.memory_space<vmem>>, vector<1x128xf32>
    %102 = vector.broadcast %15 : vector<1x128xf32> to vector<8x128xf32>
    %103 = arith.mulf %99, %102 : vector<8x128xf32>
    %104 = vector.broadcast %22 : vector<1x128xf32> to vector<8x128xf32>
    %105 = arith.mulf %99, %104 : vector<8x128xf32>
    %cst_32 = arith.constant dense<0.000000e+00> : vector<8xf32>
    %106 = vector.multi_reduction <add>, %103, %cst_32 [1] : vector<8x128xf32> to vector<8xf32>
    %107 = vector.shape_cast %106 : vector<8xf32> to vector<8x1xf32>
    %cst_33 = arith.constant dense<0.000000e+00> : vector<8xf32>
    %108 = vector.multi_reduction <add>, %105, %cst_33 [1] : vector<8x128xf32> to vector<8xf32>
    %109 = vector.shape_cast %108 : vector<8xf32> to vector<8x1xf32>
    %110 = arith.mulf %103, %99 : vector<8x128xf32>
    %cst_34 = arith.constant dense<0.000000e+00> : vector<8xf32>
    %111 = vector.multi_reduction <add>, %110, %cst_34 [1] : vector<8x128xf32> to vector<8xf32>
    %112 = vector.shape_cast %111 : vector<8xf32> to vector<8x1xf32>
    %113 = arith.mulf %105, %99 : vector<8x128xf32>
    %cst_35 = arith.constant dense<0.000000e+00> : vector<8xf32>
    %114 = vector.multi_reduction <add>, %113, %cst_35 [1] : vector<8x128xf32> to vector<8xf32>
    %115 = vector.shape_cast %114 : vector<8xf32> to vector<8x1xf32>
    %cst_36 = arith.constant 3.125000e-02 : f32
    %116 = vector.broadcast %cst_36 : f32 to vector<8x1xf32>
    %117 = arith.mulf %107, %116 : vector<8x1xf32>
    %cst_37 = arith.constant 3.125000e-02 : f32
    %118 = vector.broadcast %cst_37 : f32 to vector<8x1xf32>
    %119 = arith.mulf %109, %118 : vector<8x1xf32>
    %cst_38 = arith.constant 3.125000e-02 : f32
    %120 = vector.broadcast %cst_38 : f32 to vector<8x1xf32>
    %121 = arith.mulf %112, %120 : vector<8x1xf32>
    %122 = arith.mulf %117, %117 : vector<8x1xf32>
    %123 = arith.subf %121, %122 : vector<8x1xf32>
    %cst_39 = arith.constant 0.000000e+00 : f32
    %124 = vector.broadcast %cst_39 : f32 to vector<8x1xf32>
    %125 = arith.maximumf %123, %124 : vector<8x1xf32>
    %cst_40 = arith.constant 3.125000e-02 : f32
    %126 = vector.broadcast %cst_40 : f32 to vector<8x1xf32>
    %127 = arith.mulf %115, %126 : vector<8x1xf32>
    %128 = arith.mulf %119, %119 : vector<8x1xf32>
    %129 = arith.subf %127, %128 : vector<8x1xf32>
    %cst_41 = arith.constant 0.000000e+00 : f32
    %130 = vector.broadcast %cst_41 : f32 to vector<8x1xf32>
    %131 = arith.maximumf %129, %130 : vector<8x1xf32>
    %132 = vector.broadcast %15 : vector<1x128xf32> to vector<8x128xf32>
    %133 = vector.broadcast %117 : vector<8x1xf32> to vector<8x128xf32>
    %134 = arith.mulf %132, %133 : vector<8x128xf32>
    %135 = vector.broadcast %22 : vector<1x128xf32> to vector<8x128xf32>
    %136 = vector.broadcast %119 : vector<8x1xf32> to vector<8x128xf32>
    %137 = arith.mulf %135, %136 : vector<8x128xf32>
    %138 = arith.addf %134, %137 : vector<8x128xf32>
    %cst_42 = arith.constant 9.99999974E-6 : f32
    %139 = vector.broadcast %cst_42 : f32 to vector<8x1xf32>
    %140 = arith.addf %125, %139 : vector<8x1xf32>
    %141 = math.rsqrt %140 : vector<8x1xf32>
    %142 = vector.broadcast %15 : vector<1x128xf32> to vector<8x128xf32>
    %143 = vector.broadcast %141 : vector<8x1xf32> to vector<8x128xf32>
    %144 = arith.mulf %142, %143 : vector<8x128xf32>
    %cst_43 = arith.constant 9.99999974E-6 : f32
    %145 = vector.broadcast %cst_43 : f32 to vector<8x1xf32>
    %146 = arith.addf %131, %145 : vector<8x1xf32>
    %147 = math.rsqrt %146 : vector<8x1xf32>
    %148 = vector.broadcast %22 : vector<1x128xf32> to vector<8x128xf32>
    %149 = vector.broadcast %147 : vector<8x1xf32> to vector<8x128xf32>
    %150 = arith.mulf %148, %149 : vector<8x128xf32>
    %151 = arith.addf %144, %150 : vector<8x128xf32>
    %152 = arith.subf %99, %138 : vector<8x128xf32>
    %153 = arith.mulf %152, %151 : vector<8x128xf32>
    %154 = vector.broadcast %100 : vector<1x128xf32> to vector<8x128xf32>
    %155 = arith.mulf %153, %154 : vector<8x128xf32>
    %156 = vector.broadcast %101 : vector<1x128xf32> to vector<8x128xf32>
    %157 = arith.addf %155, %156 : vector<8x128xf32>
    %c166 = arith.constant 166 : index
    %c0_44 = arith.constant 0 : index
    %158 = vector.load %arg2[%c166, %c0_44] : memref<168x128xf32, #tpu.memory_space<vmem>>, vector<1x128xf32>
    %159 = vector.broadcast %158 : vector<1x128xf32> to vector<8x128xf32>
    %160 = arith.mulf %157, %159 : vector<8x128xf32>
    %161 = vector.broadcast %15 : vector<1x128xf32> to vector<8x128xf32>
    %162 = arith.mulf %160, %161 : vector<8x128xf32>
    %cst_45 = arith.constant dense<0.000000e+00> : vector<8xf32>
    %163 = vector.multi_reduction <add>, %162, %cst_45 [1] : vector<8x128xf32> to vector<8xf32>
    %164 = vector.shape_cast %163 : vector<8xf32> to vector<8x1xf32>
    %165 = vector.broadcast %22 : vector<1x128xf32> to vector<8x128xf32>
    %166 = arith.mulf %160, %165 : vector<8x128xf32>
    %cst_46 = arith.constant dense<0.000000e+00> : vector<8xf32>
    %167 = vector.multi_reduction <add>, %166, %cst_46 [1] : vector<8x128xf32> to vector<8xf32>
    %168 = vector.shape_cast %167 : vector<8xf32> to vector<8x1xf32>
    %c167 = arith.constant 167 : index
    %c0_47 = arith.constant 0 : index
    %169 = vector.load %arg2[%c167, %c0_47] : memref<168x128xf32, #tpu.memory_space<vmem>>, vector<1x128xf32>
    %170 = vector.extract_strided_slice %169 {offsets = [0, 0], sizes = [1, 2], strides = [1, 1]} : vector<1x128xf32> to vector<1x2xf32>
    %171 = tpu.iota {dimensions = array<i32: 1>} : vector<8x2xi32>
    %c0_i32 = arith.constant 0 : i32
    %172 = vector.broadcast %c0_i32 : i32 to vector<8x2xi32>
    %173 = arith.cmpi eq, %171, %172 : vector<8x2xi32>
    %174 = vector.shape_cast %164 : vector<8x1xf32> to vector<8x1xf32>
    %175 = vector.broadcast %174 : vector<8x1xf32> to vector<8x2xf32>
    %176 = vector.shape_cast %168 : vector<8x1xf32> to vector<8x1xf32>
    %177 = vector.broadcast %176 : vector<8x1xf32> to vector<8x2xf32>
    %178 = arith.select %173, %175, %177 : vector<8x2xi1>, vector<8x2xf32>
    %179 = vector.broadcast %170 : vector<1x2xf32> to vector<8x2xf32>
    %180 = arith.addf %178, %179 : vector<8x2xf32>
    %c0_48 = arith.constant 0 : index
    %c0_49 = arith.constant 0 : index
    %181 = vector.load %arg3[%c0_48, %c0_49] : memref<8x2xf32, #tpu.memory_space<vmem>>, vector<8x2xf32>
    tpu.vector_store %arg3[%c0_48, %c0_49], %180 {strides = array<i32>} : memref<8x2xf32, #tpu.memory_space<vmem>>, vector<8x2xf32>,
    return
  }
}

</mosaic_0001>

<bundles_post_ra>
// kernel: ln_td3_critic_forward.1
= control target key start
LH: loop header
LB: loop body
LE: loop exit
PB: predicated region body
PF: predicated region fallthrough
CT: control target
= control target key end

     0   :  { %8 = vsyncpa [#allocation3], 0  ;;  %s495_s0 = inlined_call_operand.hbm [shape: f32[8,24], index: 0, kind: input, shape index: {}]   ;;  %s496_s1 = inlined_call_operand.hbm [shape: f32[8,8], index: 1, kind: input, shape index: {}]   ;;  %s497_s2 = inlined_call_operand.hbm [shape: f32[168,128], index: 2, kind: input, shape index: {}]   ;;  %s498_s3 = inlined_call_operand.vmem [shape: f32[8,2], index: 3, kind: output, shape index: {}]  }
   0x1   :  { %9 = vsyncpa [#allocation5], 0  ;;  %s26_s14 = sshll.u32 %s496_s1, 4  ;;  %s413_s15 = smov [#allocation4]   ;;  %s27_s14 = int_to_ptr.hbm [resolvable:$true] %s26_s14 }
   0x2   :  { %s28_s16 = sshll.u32 %s413_s15, 4  ;;  %s15_s19 = sshll.u32 %s495_s0, 4  ;;  %s29_s16 = int_to_ptr.vmem [resolvable:$true] %s28_s16  ;;  %s16_s19 = int_to_ptr.hbm [resolvable:$true] %s15_s19 }
   0x3   :  { %31 = dma.hbm_to_vmem [thread:$0]  %s27_s14, 128, %s29_s16, [#allocation5]  }
   0x4   :  { %s414_s20 = smov [#allocation2]   ;;  %s36_s24 = sshll.u32 %s497_s2, 4  ;;  %s37_s24 = int_to_ptr.hbm [resolvable:$true] %s36_s24 }
   0x5   :  { %s17_s21 = sshll.u32 %s414_s20, 4  ;;  %s415_s1 = smov [#allocation6]   ;;  %s18_s21 = int_to_ptr.vmem [resolvable:$true] %s17_s21 }
   0x6   :  { %20 = dma.hbm_to_vmem [thread:$0]  %s16_s19, 128, %s18_s21, [#allocation3]  }
   0x7   :  { %s38_s25 = sshll.u32 %s415_s1, 4  ;;  %s416_s26 = smov 128   ;;  %s39_s25 = int_to_ptr.vmem [resolvable:$true] %s38_s25 }
   0x8   :  { %s417_s27 = smov 8  }
   0x9   :  { %44 = dma.hbm_to_vmem [thread:$0]  %s37_s24, 2688, %s39_s25, [#allocation5], %s416_s26, %s416_s26, %s417_s27  }
   0xa   :  { %409 = dma.done.wait [#allocation3], 128  }
   0xb   :  { %410 = vsyncadd [#allocation3], 4294967168 }
   0xc   :  { %411 = dma.done.wait [#allocation5], 2816  }
   0xd   :  { %412 = vsyncadd [#allocation5], 4294964480  ;;  %vm80_vm0 = vcmask 64512   ;;  %v77_v0 = vld [vmem:[#allocation6 + $0x10] sm:$0xff]  ;;  %v76_v1 = vld [vmem:[#allocation6 + $0x8] sm:$0xff]  ;;  %vm104_vm1 = vcmask 195584   ;;  %v57_v6 = vlaneseq }
   0xe   :  { %v79_v2 = vld [vmem:[#allocation6 + $0x18] sm:$0xff]  ;;  %121 = vmatpush.msra.mxu1 %v77_v0  ;;  %v75_v3 = vld [vmem:[#allocation6] sm:$0xff]  ;;  %v74_v5 = vld [vmem:[#allocation2] sm:$0xff]  ;;  %v418_v13 = vmov 0.0  }
   0xf   :  { %99 = vmatpush.msra.mxu0 %v79_v2  ;;  %v78_v4 = vld [vmem:[#allocation4] sm:$0xff]  ;;  %v448_v7 = vand.u32 127, %v57_v6  ;;  %v321_v9 = vld [vmem:[#allocation6 + $0xa0] ss:$0 sm:$0xff]  ;;  %v204_v22 = vld [vmem:[#allocation6 + $0x90] sm:$0xff] }
  0x10   :  { %313 = vmatmul.msk.f32.vlgmr.msra.gmra.mxu0 %vm80_vm0, %v78_v4  ;;  %122 = vmatpush.msra.mxu1 %v76_v1  ;;  %v205_v21 = vld [vmem:[#allocation6 + $0x98] sm:$0xff]  ;;  %v203_v23 = vld [vmem:[#allocation6 + $0x88] sm:$0xff]  ;;  %v202_v24 = vld [vmem:[#allocation6 + $0x80] sm:$0xff] }
  0x11   :  { %vm59_vm2 = vcmp.lt.s32.totalorder %v448_v7, 64  ;;  %vm62_vm3 = vcmp.ge.s32.totalorder %v448_v7, 64  ;;  %208 = vmatpush.msra.mxu2 %v205_v21  ;;  %v201_v25 = vld [vmem:[#allocation6 + $0x78] sm:$0xff]  ;;  %v200_v26 = vld [vmem:[#allocation6 + $0x70] sm:$0xff]  ;;  %v199_v27 = vld [vmem:[#allocation6 + $0x68] sm:$0xff]  ;;  %vm70_vm10 = vcmp.ge.s32.totalorder %v448_v7, 32 }
  0x12   :  { %123 = vmatpush.msra.mxu1 %v75_v3  ;;  %v454_v14 = vsel %vm59_vm2, 1.0, %v418_v13  ;;  %v463_v18 = vsel %vm62_vm3, 1.0, %v418_v13  ;;  %v198_v28 = vld [vmem:[#allocation6 + $0x60] sm:$0xff]  ;;  %v197_v30 = vld [vmem:[#allocation6 + $0x58] sm:$0xff]  ;;  %v196_v33 = vld [vmem:[#allocation6 + $0x50] sm:$0xff]  ;;  %vm67_vm12 = vcmp.lt.s32.totalorder %v448_v7, 32 }
  0x13   :  { %314 = vmatmul.msk.f32.vlgmr.msra.gmra.mxu1 %vm104_vm1, %v74_v5  ;;  %209 = vmatpush.msra.mxu2 %v204_v22  ;;  %v195_v36 = vld [vmem:[#allocation6 + $0x48] sm:$0xff]  ;;  %v194_v37 = vld [vmem:[#allocation6 + $0x40] sm:$0xff]  ;;  %v193_v39 = vld [vmem:[#allocation6 + $0x38] sm:$0xff]  ;;  %vm297_vm3 = vcmp.eq.s32.totalorder %v448_v7, 0 }
  0x14   :  { %v192_v42 = vld [vmem:[#allocation6 + $0x30] sm:$0xff]  ;;  %v191_v46 = vld [vmem:[#allocation6 + $0x28] sm:$0xff]  ;;  %v190_v49 = vld [vmem:[#allocation6 + $0x20] sm:$0xff] }
  0x15   :  { %210 = vmatpush.msra.mxu2 %v203_v23  ;;  %vm71_vm11 = vmand %vm70_vm10, %vm59_vm2 }
  0x17   :  { %211 = vmatpush.msra.mxu2 %v202_v24 }
  0x19   :  { %212 = vmatpush.msra.mxu2 %v201_v25 }
  0x1b   :  { %213 = vmatpush.msra.mxu2 %v200_v26 }
  0x1d   :  { %214 = vmatpush.msra.mxu2 %v199_v27 }
  0x1f   :  { %215 = vmatpush.msra.mxu2 %v198_v28 }
  0x21   :  { %216 = vmatpush.msra.mxu2 %v197_v30 }
  0x23   :  { %217 = vmatpush.msra.mxu2 %v196_v33 }
  0x25   :  { %218 = vmatpush.msra.mxu2 %v195_v36 }
  0x27   :  { %219 = vmatpush.msra.mxu2 %v194_v37 }
  0x29   :  { %220 = vmatpush.msra.mxu2 %v193_v39 }
  0x2b   :  { %221 = vmatpush.msra.mxu2 %v192_v42 }
  0x2d   :  { %222 = vmatpush.msra.mxu2 %v191_v46 }
  0x2f   :  { %223 = vmatpush.msra.mxu2 %v190_v49 }
  0x8d   :  { %v101_v8 = vpop.f32.mrf.mxu0 }
  0x90   :  { %v125_v10 = vpop.f32.mrf.mxu1 }
  0x91   :  { %v126_v11 = vadd.f32 %v125_v10, %v101_v8 }
  0x93   :  { %v130_v12 = vadd.f32 %v321_v9, %v126_v11  ;;  %v322_v11 = vld [vmem:[#allocation6 + $0xa1] ss:$0 sm:$0xff] }
  0x95   :  { %v456_v15 = vmax.f32 %v130_v12, 0.0 }
  0x97   :  { %v134_v16 = vmul.f32 %v454_v14, %v456_v15  ;;  %v135_v19 = vmul.f32 %v463_v18, %v456_v15 }
  0x99   :  { %136 = vadd.xlane.f32.xlu0 %v134_v16  ;;  %v140_v17 = vmul.f32 %v134_v16, %v456_v15  ;;  %v143_v20 = vmul.f32 %v135_v19, %v456_v15  ;;  %v323_v16 = vld [vmem:[#allocation6 + $0xa2] ss:$0 sm:$0xff] }
  0x9b   :  { %141 = vadd.xlane.f32.xlu1 %v140_v17 }
  0xa1   :  { %138 = vadd.xlane.f32.xlu0 %v135_v19 }
  0xa3   :  { %144 = vadd.xlane.f32.xlu1 %v143_v20  ;;  %v324_v20 = vld [vmem:[#allocation6 + $0xa3] ss:$0 sm:$0xff] }
 0x10c   :  { %v137_v29 = vpop.xlane.xlu0 %136 }
 0x10d   :  { %v146_v31 = vmul.f32 0.015625, %v137_v29 }
 0x10e   :  { %v142_v32 = vpop.xlane.xlu1 %141 }
 0x10f   :  { %v149_v34 = vmul.f32 %v146_v31, %v146_v31  ;;  %v148_v35 = vmul.f32 0.015625, %v142_v32  ;;  %v156_v1 = vmul.f32 %v454_v14, %v146_v31 }
 0x111   :  { %v150_v38 = vsub.f32 %v148_v35, %v149_v34 }
 0x113   :  { %v151_v40 = vmax.f32 %v150_v38, 0.0 }
 0x114   :  { %v139_v41 = vpop.xlane.xlu0 %138 }
 0x115   :  { %v159_v43 = vadd.f32 1e-05, %v151_v40  ;;  %v147_v44 = vmul.f32 0.015625, %v139_v41 }
 0x116   :  { %v145_v45 = vpop.xlane.xlu1 %144 }
 0x117   :  { %329 = vrsqrt.f32 %v159_v43  ;;  %v153_v47 = vmul.f32 %v147_v44, %v147_v44  ;;  %v152_v48 = vmul.f32 0.015625, %v145_v45  ;;  %v157_v63 = vmul.f32 %v463_v18, %v147_v44 }
 0x118   :  { %vm166_vm5 = vweird.f32 %v159_v43 }
 0x119   :  { %v154_v50 = vsub.f32 %v152_v48, %v153_v47  ;;  %v158_v4 = vadd.f32 %v157_v63, %v156_v1  ;;  %v325_v63 = vld [vmem:[#allocation6 + $0xa4] ss:$0 sm:$0xff]  ;;  %v326_v1 = vld [vmem:[#allocation6 + $0xa5] ss:$0 sm:$0xff] }
 0x11b   :  { %v155_v51 = vmax.f32 %v154_v50, 0.0  ;;  %v184_v9 = vsub.f32 %v456_v15, %v158_v4  ;;  %v481_v15 = vsel %vm67_vm12, 1.0, %v418_v13 }
 0x11d   :  { %v330_v52 = vpop.eup %329  ;;  %v171_v54 = vadd.f32 1e-05, %v155_v51 }
 0x11e   :  { %v161_v53 = vmul.f32 %v330_v52, %v159_v43  ;;  %vm167_vm4 = vweird.f32 %v330_v52 }
 0x11f   :  { %331 = vrsqrt.f32 %v171_v54  ;;  %vm168_vm7 = vmor %vm166_vm5, %vm167_vm4  ;;  %vm178_vm8 = vweird.f32 %v171_v54  ;;  %vm301_vm4 = vcmask 15360  }
 0x120   :  { %v162_v55 = vmul.f32 %v330_v52, %v161_v53 }
 0x122   :  { %v163_v56 = vmul.f32 0.5, %v162_v55 }
 0x124   :  { %v164_v58 = vsub.f32 1.5, %v163_v56 }
 0x125   :  { %v332_v57 = vpop.eup %331 }
 0x126   :  { %v173_v59 = vmul.f32 %v332_v57, %v171_v54  ;;  %v165_v61 = vmul.f32 %v330_v52, %v164_v58  ;;  %vm179_vm6 = vweird.f32 %v332_v57 }
 0x127   :  { %vm180_vm9 = vmor %vm178_vm8, %vm179_vm6 }
 0x128   :  { %v174_v60 = vmul.f32 %v332_v57, %v173_v59  ;;  %v169_v3 = vsel %vm168_vm7, %v330_v52, %v165_v61 }
 0x129   :  { %v170_v6 = vmul.f32 %v454_v14, %v169_v3  ;;  %v327_v3 = vld [vmem:[#allocation6 + $0xa6] ss:$0 sm:$0xff] }
 0x12a   :  { %v175_v62 = vmul.f32 0.5, %v174_v60 }
 0x12c   :  { %v176_v0 = vsub.f32 1.5, %v175_v62 }
 0x12e   :  { %v177_v2 = vmul.f32 %v332_v57, %v176_v0 }
 0x130   :  { %v181_v5 = vsel %vm180_vm9, %v332_v57, %v177_v2 }
 0x131   :  { %v182_v8 = vmul.f32 %v463_v18, %v181_v5  ;;  %v478_v18 = vsel %vm71_vm11, 1.0, %v418_v13 }
 0x133   :  { %v183_v10 = vadd.f32 %v182_v8, %v170_v6 }
 0x135   :  { %v185_v12 = vmul.f32 %v184_v9, %v183_v10  ;;  %v328_v9 = vld [vmem:[#allocation6 + $0xa7] ss:$0 sm:$0xff] }
 0x137   :  { %v187_v17 = vmul.f32 %v322_v11, %v185_v12 }
 0x139   :  { %v189_v19 = vadd.f32 %v323_v16, %v187_v17 }
 0x13b   :  { %224 = vmatmul.f32.vlgmr.msra.gmra.mxu2 %v189_v19 }
 0x1be   :  { %v225_v14 = vpop.f32.mrf.mxu2 }
 0x1bf   :  { %v226_v21 = vadd.f32 %v324_v20, %v225_v14 }
 0x1c1   :  { %v228_v22 = vmax.f32 %v226_v21, 0.0 }
 0x1c3   :  { %v231_v23 = vmul.f32 %v481_v15, %v228_v22  ;;  %v232_v24 = vmul.f32 %v478_v18, %v228_v22 }
 0x1c5   :  { %233 = vadd.xlane.f32.xlu2 %v231_v23  ;;  %v240_v25 = vmul.f32 %v232_v24, %v228_v22  ;;  %v237_v26 = vmul.f32 %v231_v23, %v228_v22 }
 0x1c7   :  { %241 = vadd.xlane.f32.xlu1 %v240_v25  ;;  %238 = vadd.xlane.f32.xlu0 %v237_v26 }
 0x1cd   :  { %235 = vadd.xlane.f32.xlu2 %v232_v24 }
 0x238   :  { %v234_v27 = vpop.xlane.xlu2 %233 }
 0x239   :  { %v243_v28 = vmul.f32 0.03125, %v234_v27 }
 0x23a   :  { %v239_v29 = vpop.xlane.xlu0 %238  ;;  %v242_v13 = vpop.xlane.xlu1 %241 }
 0x23b   :  { %v246_v30 = vmul.f32 %v243_v28, %v243_v28  ;;  %v245_v31 = vmul.f32 0.03125, %v239_v29  ;;  %v249_v37 = vmul.f32 0.03125, %v242_v13  ;;  %v253_v54 = vmul.f32 %v481_v15, %v243_v28 }
 0x23d   :  { %v247_v32 = vsub.f32 %v245_v31, %v246_v30 }
 0x23f   :  { %v248_v33 = vmax.f32 %v247_v32, 0.0 }
 0x240   :  { %v236_v34 = vpop.xlane.xlu2 %235 }
 0x241   :  { %v256_v35 = vadd.f32 1e-05, %v248_v33  ;;  %v244_v36 = vmul.f32 0.03125, %v236_v34 }
 0x243   :  { %333 = vrsqrt.f32 %v256_v35  ;;  %v250_v38 = vmul.f32 %v244_v36, %v244_v36  ;;  %v254_v52 = vmul.f32 %v478_v18, %v244_v36  ;;  %vm263_vm14 = vweird.f32 %v256_v35 }
 0x245   :  { %v251_v39 = vsub.f32 %v249_v37, %v250_v38  ;;  %v255_v57 = vadd.f32 %v254_v52, %v253_v54 }
 0x247   :  { %v252_v40 = vmax.f32 %v251_v39, 0.0  ;;  %v281_v62 = vsub.f32 %v228_v22, %v255_v57 }
 0x249   :  { %v334_v41 = vpop.eup %333  ;;  %v268_v42 = vadd.f32 1e-05, %v252_v40 }
 0x24a   :  { %v258_v43 = vmul.f32 %v334_v41, %v256_v35  ;;  %vm264_vm13 = vweird.f32 %v334_v41 }
 0x24b   :  { %335 = vrsqrt.f32 %v268_v42  ;;  %vm265_vm0 = vmor %vm263_vm14, %vm264_vm13  ;;  %vm275_vm1 = vweird.f32 %v268_v42 }
 0x24c   :  { %v259_v44 = vmul.f32 %v334_v41, %v258_v43 }
 0x24e   :  { %v260_v45 = vmul.f32 0.5, %v259_v44 }
 0x250   :  { %v261_v47 = vsub.f32 1.5, %v260_v45 }
 0x251   :  { %v336_v46 = vpop.eup %335 }
 0x252   :  { %v270_v48 = vmul.f32 %v336_v46, %v268_v42  ;;  %v262_v50 = vmul.f32 %v334_v41, %v261_v47  ;;  %vm276_vm15 = vweird.f32 %v336_v46 }
 0x253   :  { %vm277_vm2 = vmor %vm275_vm1, %vm276_vm15 }
 0x254   :  { %v271_v49 = vmul.f32 %v336_v46, %v270_v48  ;;  %v266_v55 = vsel %vm265_vm0, %v334_v41, %v262_v50 }
 0x255   :  { %v267_v59 = vmul.f32 %v481_v15, %v266_v55 }
 0x256   :  { %v272_v51 = vmul.f32 0.5, %v271_v49 }
 0x258   :  { %v273_v53 = vsub.f32 1.5, %v272_v51 }
 0x25a   :  { %v274_v56 = vmul.f32 %v336_v46, %v273_v53 }
 0x25c   :  { %v278_v58 = vsel %vm277_vm2, %v336_v46, %v274_v56 }
 0x25d   :  { %v279_v60 = vmul.f32 %v478_v18, %v278_v58 }
 0x25f   :  { %v280_v61 = vadd.f32 %v279_v60, %v267_v59 }
 0x261   :  { %v282_v0 = vmul.f32 %v281_v62, %v280_v61 }
 0x263   :  { %v284_v2 = vmul.f32 %v325_v63, %v282_v0 }
 0x265   :  { %v286_v4 = vadd.f32 %v326_v1, %v284_v2 }
 0x267   :  { %v289_v5 = vmul.f32 %v327_v3, %v286_v4 }
 0x269   :  { %v293_v6 = vmul.f32 %v478_v18, %v289_v5  ;;  %v290_v8 = vmul.f32 %v481_v15, %v289_v5 }
 0x26b   :  { %294 = vadd.xlane.f32.xlu0 %v293_v6  ;;  %291 = vadd.xlane.f32.xlu2 %v290_v8 }
 0x2de   :  { %v295_v10 = vpop.xlane.xlu0 %294  ;;  %v292_v11 = vpop.xlane.xlu2 %291 }
 0x2df   :  { %v298_v12 = vsel %vm297_vm3, %v292_v11, %v295_v10 }
 0x2e0   :  { %v300_v16 = vadd.f32 %v328_v9, %v298_v12 }
 0x2e2   :  { %302 = vst.msk [vmem:[%s498_s3] sm:$0xff] %vm301_vm4, %v300_v16 }
 0x2e3   :  { %307 = vsyncpa [#allocation3], 1 }
 0x2e4   :  { %308 = vsyncpa [#allocation5], 1 }

</bundles_post_ra>
